<compile_context>
chip_gen: v7x
topology: tpu7x:2x2x1
jax: 0.10.0
libtpu: 0.0.40
codegen_flags: <defaults>
</compile_context>

<pallas_src>
import functools

import jax
import jax.numpy as jnp
from jax.experimental import pallas as pl
from jax.experimental.pallas import tpu as pltpu


# ---------------------------------------------------------------------------
# Reflect-shift helpers on the flat (C, H*W) layout (lane axis = H*W)
# ---------------------------------------------------------------------------

def _col_eq(lane, j, W):
    """Boolean (1, HW) mask: flat index has column == j (row-major H x W)."""
    if W & (W - 1) == 0:                       # power-of-two fast path
        return jnp.bitwise_and(lane, W - 1) == j
    return lane % W == j


def _row_eq(lane, i, W):
    """Boolean (1, HW) mask: flat index lies in row i (comparisons only)."""
    return jnp.logical_and(lane >= i * W, lane < (i + 1) * W)


def _shift_cols_reflect(a, dc, lane, W, HW):
    """out[:, i*W + j] = a[:, i*W + reflect(j + dc)]  (reflect, no edge repeat)."""
    if dc == 0:
        return a
    out = pltpu.roll(a, shift=(-dc) % HW, axis=1)          # interior columns
    if dc < 0:                                              # left border j in [0, -dc)
        for j in range(-dc):
            fix = pltpu.roll(a, shift=(2 * j + dc) % HW, axis=1)
            out = jnp.where(_col_eq(lane, j, W), fix, out)
    else:                                                   # right border j in [W-dc, W)
        for j in range(W - dc, W):
            fix = pltpu.roll(a, shift=(2 * j + dc - 2 * (W - 1)) % HW, axis=1)
            out = jnp.where(_col_eq(lane, j, W), fix, out)
    return out


def _shift_rows_reflect(a, dr, lane, H, W, HW):
    """out[:, i*W + j] = a[:, reflect(i + dr)*W + j]."""
    if dr == 0:
        return a
    out = pltpu.roll(a, shift=(-dr * W) % HW, axis=1)       # interior rows
    if dr < 0:                                              # top border rows i in [0, -dr)
        for i in range(-dr):
            fix = pltpu.roll(a, shift=((2 * i + dr) * W) % HW, axis=1)
            out = jnp.where(_row_eq(lane, i, W), fix, out)
    else:                                                   # bottom border rows
        for i in range(H - dr, H):
            fix = pltpu.roll(a, shift=((2 * i + dr - 2 * (H - 1)) * W) % HW, axis=1)
            out = jnp.where(_row_eq(lane, i, W), fix, out)
    return out


# ---------------------------------------------------------------------------
# Fused Convunit kernel
# ---------------------------------------------------------------------------

def _convunit_kernel(x_ref, w1_ref, w2t_ref, w3_ref, sw1t_ref, sw2_ref, o_ref,
                     *, H, W, k, dil, has_se, skip):
    HW = H * W
    mid = w1_ref.shape[0]
    ctr = (k - 1) // 2

    x = x_ref[0]                                            # (C_in, HW) f32

    # Flat lane-index iota, hoisted once (used only for boundary masks).
    lane = jax.lax.broadcasted_iota(jnp.int32, (1, HW), 1)

    # ---- conv1 (1x1, bias-free) + ReLU: bf16 MXU operands, f32 accum --------
    h1 = jnp.maximum(
        jnp.dot(w1_ref[...].astype(jnp.bfloat16), x.astype(jnp.bfloat16),
                preferred_element_type=jnp.float32), 0.0)   # (mid, HW) f32

    # ---- conv2 (k x k, dilated, reflect boundary) as k*k shifted-tap matmuls.
    # Each tap: roll h1 along the flat HW lane axis (XLU), fix the reflect
    # border with a few masked selects (VPU), then one small MXU matmul.
    h2 = jnp.zeros((mid, HW), jnp.float32)
    for dj in range(k):
        dc = (dj - ctr) * dil
        cs = _shift_cols_reflect(h1, dc, lane, W, HW)       # reuse across di
        for di in range(k):
            dr = (di - ctr) * dil
            tap = _shift_rows_reflect(cs, dr, lane, H, W, HW)
            w_tap = w2t_ref[di * k + dj].astype(jnp.bfloat16)   # (mid, mid)
            h2 = h2 + jnp.dot(w_tap, tap.astype(jnp.bfloat16),
                              preferred_element_type=jnp.float32)
    h2 = jnp.maximum(h2, 0.0)                               # ReLU (f32)

    # ---- conv3 (1x1, bias-free) ----------------------------------------------
    h3 = jnp.dot(w3_ref[...].astype(jnp.bfloat16), h2.astype(jnp.bfloat16),
                 preferred_element_type=jnp.float32)        # (C_out, HW) f32

    # ---- Squeeze-Excitation: VPU/XLU reductions only, f32 ---------------------
    if has_se:
        m = jnp.mean(h3, axis=-1, keepdims=True)            # (C_out, 1)
        # z = relu(fc1 @ m); sw1t is fc1 weight transposed: (C_out, C_out//r)
        z = jnp.maximum(jnp.sum(sw1t_ref[...] * m, axis=0, keepdims=True), 0.0)
        # s = sigmoid(fc2 @ z); sw2: (C_out, C_out//r), z: (1, C_out//r)
        s = jax.nn.sigmoid(jnp.sum(sw2_ref[...] * z, axis=-1, keepdims=True))
        h3 = h3 * s

    # ---- identity skip (exact f32 x) ------------------------------------------
    # TODO(synk): drop_connect (stochastic depth) is a training-time op; this
    # inference forward treats it as identity.
    out = x + h3 if skip else h3
    o_ref[0] = out.astype(o_ref.dtype)


# ---------------------------------------------------------------------------
# Wrapper
# ---------------------------------------------------------------------------

def convunit_forward(params, x, *, kernel_size=3, dilation=1,
                     has_se=True, skip=True):
    B, C_in, H, W = x.shape
    w1 = params["conv1_w"]                       # (mid, C_in)
    w2 = params["conv2_w"]                       # (mid, mid, k, k)
    w3 = params["conv3_w"]                       # (C_out, mid)
    sw1 = params["se_fc1_w"]                     # (C_out // r, C_out)
    sw2 = params["se_fc2_w"]                     # (C_out, C_out // r)
    mid, k = w1.shape[0], kernel_size
    C_out = w3.shape[0]
    HW = H * W
    p = (k - 1) // 2 * dilation

    assert k % 2 == 1, "odd kernel_size required to preserve spatial size"
    assert p < min(H, W), "reflect pad must be smaller than the spatial size"
    if skip:
        assert C_in == C_out, "identity skip requires in_channels == out_channels"

    # Tap-major conv2 weights: w2t[di*k + dj] == w2[:, :, di, dj]  (k*k, mid, mid)
    w2t = jnp.transpose(w2, (2, 3, 0, 1)).reshape(k * k, mid, mid)
    sw1t = jnp.transpose(sw1)                    # (C_out, C_out // r)
    x_f = x.reshape(B, C_in, HW)                 # lane-dense HBM layout (free reshape)

    kernel = functools.partial(_convunit_kernel, H=H, W=W, k=k, dil=dilation,
                               has_se=has_se, skip=skip)

    itemsize = x.dtype.itemsize
    weight_bytes = sum(int(a.size) * a.dtype.itemsize
                       for a in (w1, w2t, w3, sw1t, sw2))
    cost = pl.CostEstimate(
        flops=2 * B * HW * (C_in * mid + k * k * mid * mid + mid * C_out),
        transcendentals=(B * C_out) if has_se else 0,
        bytes_accessed=int(x_f.size) * itemsize + B * C_out * HW * itemsize
        + weight_bytes)

    out_f = pl.pallas_call(
        kernel,
        out_shape=jax.ShapeDtypeStruct((B, C_out, HW), x.dtype),
        grid=(B,),
        in_specs=[
            pl.BlockSpec((1, C_in, HW), lambda b: (b, 0, 0)),
            pl.BlockSpec((mid, C_in), lambda b: (0, 0)),
            pl.BlockSpec((k * k, mid, mid), lambda b: (0, 0, 0)),
            pl.BlockSpec((C_out, mid), lambda b: (0, 0)),
            pl.BlockSpec(sw1t.shape, lambda b: (0, 0)),
            pl.BlockSpec(sw2.shape, lambda b: (0, 0)),
        ],
        out_specs=pl.BlockSpec((1, C_out, HW), lambda b: (b, 0, 0)),
        compiler_params=pltpu.CompilerParams(
            dimension_semantics=("parallel",),
            vmem_limit_bytes=32 * 1024 * 1024),
        cost_estimate=cost,
    )(x_f, w1, w2t, w3, sw1t, sw2)
    return out_f.reshape(B, C_out, H, W)


# ---------------------------------------------------------------------------
# Pure-JAX reference (for correctness check)
# ---------------------------------------------------------------------------

def convunit_ref(params, x, *, kernel_size=3, dilation=1,
                 has_se=True, skip=True):
    dn = ("NCHW", "OIHW", "NCHW")
    prec = jax.lax.Precision.HIGHEST
    p = (kernel_size - 1) // 2 * dilation
    w1 = params["conv1_w"][:, :, None, None]
    w3 = params["conv3_w"][:, :, None, None]
    h = jax.lax.conv_general_dilated(x, w1, (1, 1), "VALID",
                                     dimension_numbers=dn, precision=prec)
    h = jax.nn.relu(h)
    h = jnp.pad(h, ((0, 0), (0, 0), (p, p), (p, p)), mode="reflect")
    h = jax.lax.conv_general_dilated(h, params["conv2_w"], (1, 1), "VALID",
                                     rhs_dilation=(dilation, dilation),
                                     dimension_numbers=dn, precision=prec)
    h = jax.nn.relu(h)
    h = jax.lax.conv_general_dilated(h, w3, (1, 1), "VALID",
                                     dimension_numbers=dn, precision=prec)
    if has_se:
        m = jnp.mean(h, axis=(2, 3))
        z = jax.nn.relu(m @ params["se_fc1_w"].T)
        s = jax.nn.sigmoid(z @ params["se_fc2_w"].T)
        h = h * s[:, :, None, None]
    return x + h if skip else h


# ---------------------------------------------------------------------------
# Demo
# ---------------------------------------------------------------------------

if __name__ == "__main__":
    B, C, H, W = 2, 16, 16, 16          # in_channels == out_channels (skip path)
    k, dil = 3, 1
    mid = C // 2                        # Convunit default: out_channels // 2
    red = 4                             # SELayer reduction

    key = jax.random.PRNGKey(0)
    ks = jax.random.split(key, 6)
    s = 0.1
    params = {
        "conv1_w": s * jax.random.normal(ks[0], (mid, C), jnp.float32),
        "conv2_w": s * jax.random.normal(ks[1], (mid, mid, k, k), jnp.float32),
        "conv3_w": s * jax.random.normal(ks[2], (C, mid), jnp.float32),
        "se_fc1_w": s * jax.random.normal(ks[3], (C // red, C), jnp.float32),
        "se_fc2_w": s * jax.random.normal(ks[4], (C, C // red), jnp.float32),
    }
    x = jax.random.normal(ks[5], (B, C, H, W), jnp.float32)

    out = convunit_forward(params, x, kernel_size=k, dilation=dil)
    out = jax.block_until_ready(out)
    assert out.shape == (B, C, H, W), out.shape
    assert bool(jnp.all(jnp.isfinite(out)))

    ref = jax.block_until_ready(convunit_ref(params, x, kernel_size=k, dilation=dil))
    err = float(jnp.max(jnp.abs(out - ref)))
    # Tolerance accounts for bf16 matmul operands (f32 accumulation, f32 skip/SE).
    assert err < 3e-2, f"mismatch vs reference: max abs err = {err}"

    print("KERNEL_OK")
</pallas_src>

<mosaic_0001>
module attributes {stable_mosaic.version = 11 : i64} {
  func.func @_convunit_kernel(%arg0: i32, %arg1: memref<1x16x256xf32, #tpu.memory_space<vmem>>, %arg2: memref<8x16xf32, #tpu.memory_space<vmem>>, %arg3: memref<9x8x8xf32, #tpu.memory_space<vmem>>, %arg4: memref<16x8xf32, #tpu.memory_space<vmem>>, %arg5: memref<16x4xf32, #tpu.memory_space<vmem>>, %arg6: memref<16x4xf32, #tpu.memory_space<vmem>>, %arg7: memref<1x16x256xf32, #tpu.memory_space<vmem>>) attributes {dimension_semantics = [#tpu.dimension_semantics<parallel>], iteration_bounds = array<i64: 2>, scalar_prefetch = 0 : i64, scratch_operands = 0 : i64, tpu.core_type = #tpu.core_type<tc>, window_params = [{transform_indices = @transform_0, window_bounds = array<i64: 1, 16, 256>}, {pipeline_mode = #tpu.pipeline_mode<synchronous>, transform_indices = @transform_1, window_bounds = array<i64: 8, 16>}, {pipeline_mode = #tpu.pipeline_mode<synchronous>, transform_indices = @transform_2, window_bounds = array<i64: 9, 8, 8>}, {pipeline_mode = #tpu.pipeline_mode<synchronous>, transform_indices = @transform_3, window_bounds = array<i64: 16, 8>}, {pipeline_mode = #tpu.pipeline_mode<synchronous>, transform_indices = @transform_4, window_bounds = array<i64: 16, 4>}, {pipeline_mode = #tpu.pipeline_mode<synchronous>, transform_indices = @transform_5, window_bounds = array<i64: 16, 4>}, {transform_indices = @transform_6, window_bounds = array<i64: 1, 16, 256>}]} {
    %c0 = arith.constant 0 : index
    %c0_0 = arith.constant 0 : index
    %c0_1 = arith.constant 0 : index
    %0 = vector.load %arg1[%c0, %c0_0, %c0_1] : memref<1x16x256xf32, #tpu.memory_space<vmem>>, vector<1x16x256xf32>
    %1 = vector.shape_cast %0 : vector<1x16x256xf32> to vector<16x256xf32>
    %2 = tpu.iota {dimensions = array<i32: 1>} : vector<1x256xi32>
    %c0_2 = arith.constant 0 : index
    %c0_3 = arith.constant 0 : index
    %3 = vector.load %arg2[%c0_2, %c0_3] : memref<8x16xf32, #tpu.memory_space<vmem>>, vector<8x16xf32>
    %4 = arith.truncf %3 : vector<8x16xf32> to vector<8x16xbf16>
    %5 = arith.truncf %1 : vector<16x256xf32> to vector<16x256xbf16>
    %cst = arith.constant dense<0.000000e+00> : vector<8x256xf32>
    %6 = tpu.matmul %4, %5, %cst {dimension_numbers = #tpu.dot_dimension_numbers<[1], [0], [0], [1], [0, 0, 1, 1], [], []>} : vector<8x16xbf16>, vector<16x256xbf16>, vector<8x256xf32> -> vector<8x256xf32>
    %cst_4 = arith.constant 0.000000e+00 : f32
    %7 = vector.broadcast %cst_4 : f32 to vector<8x256xf32>
    %8 = arith.maximumf %6, %7 : vector<8x256xf32>
    %cst_5 = arith.constant 0.000000e+00 : f32
    %9 = vector.broadcast %cst_5 : f32 to vector<8x256xf32>
    %c1_i32 = arith.constant 1 : i32
    %10 = tpu.dynamic_rotate %8 by %c1_i32 dim 1 : vector<8x256xf32>, i32 -> vector<8x256xf32>
    %c255_i32 = arith.constant 255 : i32
    %11 = tpu.dynamic_rotate %8 by %c255_i32 dim 1 : vector<8x256xf32>, i32 -> vector<8x256xf32>
    %c15_i32 = arith.constant 15 : i32
    %12 = vector.broadcast %c15_i32 : i32 to vector<1x256xi32>
    %13 = arith.andi %2, %12 : vector<1x256xi32>
    %c0_i32 = arith.constant 0 : i32
    %14 = vector.broadcast %c0_i32 : i32 to vector<1x256xi32>
    %15 = arith.cmpi eq, %13, %14 : vector<1x256xi32>
    %16 = vector.shape_cast %15 : vector<1x256xi1> to vector<1x256xi1>
    %17 = vector.broadcast %16 : vector<1x256xi1> to vector<8x256xi1>
    %18 = arith.select %17, %11, %10 : vector<8x256xi1>, vector<8x256xf32>
    %c16_i32 = arith.constant 16 : i32
    %19 = tpu.dynamic_rotate %18 by %c16_i32 dim 1 : vector<8x256xf32>, i32 -> vector<8x256xf32>
    %c240_i32 = arith.constant 240 : i32
    %20 = tpu.dynamic_rotate %18 by %c240_i32 dim 1 : vector<8x256xf32>, i32 -> vector<8x256xf32>
    %c0_i32_6 = arith.constant 0 : i32
    %21 = vector.broadcast %c0_i32_6 : i32 to vector<1x256xi32>
    %22 = arith.cmpi sge, %2, %21 : vector<1x256xi32>
    %c16_i32_7 = arith.constant 16 : i32
    %23 = vector.broadcast %c16_i32_7 : i32 to vector<1x256xi32>
    %24 = arith.cmpi slt, %2, %23 : vector<1x256xi32>
    %25 = arith.andi %22, %24 : vector<1x256xi1>
    %26 = vector.shape_cast %25 : vector<1x256xi1> to vector<1x256xi1>
    %27 = vector.broadcast %26 : vector<1x256xi1> to vector<8x256xi1>
    %28 = arith.select %27, %20, %19 : vector<8x256xi1>, vector<8x256xf32>
    %c0_8 = arith.constant 0 : index
    %c0_9 = arith.constant 0 : index
    %c0_10 = arith.constant 0 : index
    %29 = vector.load %arg3[%c0_8, %c0_9, %c0_10] : memref<9x8x8xf32, #tpu.memory_space<vmem>>, vector<1x8x8xf32>
    %30 = vector.shape_cast %29 : vector<1x8x8xf32> to vector<8x8xf32>
    %31 = arith.truncf %30 : vector<8x8xf32> to vector<8x8xbf16>
    %32 = arith.truncf %28 : vector<8x256xf32> to vector<8x256xbf16>
    %cst_11 = arith.constant dense<0.000000e+00> : vector<8x256xf32>
    %33 = tpu.matmul %31, %32, %cst_11 {dimension_numbers = #tpu.dot_dimension_numbers<[1], [0], [0], [1], [0, 0, 1, 1], [], []>} : vector<8x8xbf16>, vector<8x256xbf16>, vector<8x256xf32> -> vector<8x256xf32>
    %34 = arith.addf %9, %33 : vector<8x256xf32>
    %c3 = arith.constant 3 : index
    %c0_12 = arith.constant 0 : index
    %c0_13 = arith.constant 0 : index
    %35 = vector.load %arg3[%c3, %c0_12, %c0_13] : memref<9x8x8xf32, #tpu.memory_space<vmem>>, vector<1x8x8xf32>
    %36 = vector.shape_cast %35 : vector<1x8x8xf32> to vector<8x8xf32>
    %37 = arith.truncf %36 : vector<8x8xf32> to vector<8x8xbf16>
    %38 = arith.truncf %18 : vector<8x256xf32> to vector<8x256xbf16>
    %cst_14 = arith.constant dense<0.000000e+00> : vector<8x256xf32>
    %39 = tpu.matmul %37, %38, %cst_14 {dimension_numbers = #tpu.dot_dimension_numbers<[1], [0], [0], [1], [0, 0, 1, 1], [], []>} : vector<8x8xbf16>, vector<8x256xbf16>, vector<8x256xf32> -> vector<8x256xf32>
    %40 = arith.addf %34, %39 : vector<8x256xf32>
    %c240_i32_15 = arith.constant 240 : i32
    %41 = tpu.dynamic_rotate %18 by %c240_i32_15 dim 1 : vector<8x256xf32>, i32 -> vector<8x256xf32>
    %c16_i32_16 = arith.constant 16 : i32
    %42 = tpu.dynamic_rotate %18 by %c16_i32_16 dim 1 : vector<8x256xf32>, i32 -> vector<8x256xf32>
    %c240_i32_17 = arith.constant 240 : i32
    %43 = vector.broadcast %c240_i32_17 : i32 to vector<1x256xi32>
    %44 = arith.cmpi sge, %2, %43 : vector<1x256xi32>
    %c256_i32 = arith.constant 256 : i32
    %45 = vector.broadcast %c256_i32 : i32 to vector<1x256xi32>
    %46 = arith.cmpi slt, %2, %45 : vector<1x256xi32>
    %47 = arith.andi %44, %46 : vector<1x256xi1>
    %48 = vector.shape_cast %47 : vector<1x256xi1> to vector<1x256xi1>
    %49 = vector.broadcast %48 : vector<1x256xi1> to vector<8x256xi1>
    %50 = arith.select %49, %42, %41 : vector<8x256xi1>, vector<8x256xf32>
    %c6 = arith.constant 6 : index
    %c0_18 = arith.constant 0 : index
    %c0_19 = arith.constant 0 : index
    %51 = vector.load %arg3[%c6, %c0_18, %c0_19] : memref<9x8x8xf32, #tpu.memory_space<vmem>>, vector<1x8x8xf32>
    %52 = vector.shape_cast %51 : vector<1x8x8xf32> to vector<8x8xf32>
    %53 = arith.truncf %52 : vector<8x8xf32> to vector<8x8xbf16>
    %54 = arith.truncf %50 : vector<8x256xf32> to vector<8x256xbf16>
    %cst_20 = arith.constant dense<0.000000e+00> : vector<8x256xf32>
    %55 = tpu.matmul %53, %54, %cst_20 {dimension_numbers = #tpu.dot_dimension_numbers<[1], [0], [0], [1], [0, 0, 1, 1], [], []>} : vector<8x8xbf16>, vector<8x256xbf16>, vector<8x256xf32> -> vector<8x256xf32>
    %56 = arith.addf %40, %55 : vector<8x256xf32>
    %c16_i32_21 = arith.constant 16 : i32
    %57 = tpu.dynamic_rotate %8 by %c16_i32_21 dim 1 : vector<8x256xf32>, i32 -> vector<8x256xf32>
    %c240_i32_22 = arith.constant 240 : i32
    %58 = tpu.dynamic_rotate %8 by %c240_i32_22 dim 1 : vector<8x256xf32>, i32 -> vector<8x256xf32>
    %c0_i32_23 = arith.constant 0 : i32
    %59 = vector.broadcast %c0_i32_23 : i32 to vector<1x256xi32>
    %60 = arith.cmpi sge, %2, %59 : vector<1x256xi32>
    %c16_i32_24 = arith.constant 16 : i32
    %61 = vector.broadcast %c16_i32_24 : i32 to vector<1x256xi32>
    %62 = arith.cmpi slt, %2, %61 : vector<1x256xi32>
    %63 = arith.andi %60, %62 : vector<1x256xi1>
    %64 = vector.shape_cast %63 : vector<1x256xi1> to vector<1x256xi1>
    %65 = vector.broadcast %64 : vector<1x256xi1> to vector<8x256xi1>
    %66 = arith.select %65, %58, %57 : vector<8x256xi1>, vector<8x256xf32>
    %c1 = arith.constant 1 : index
    %c0_25 = arith.constant 0 : index
    %c0_26 = arith.constant 0 : index
    %67 = vector.load %arg3[%c1, %c0_25, %c0_26] : memref<9x8x8xf32, #tpu.memory_space<vmem>>, vector<1x8x8xf32>
    %68 = vector.shape_cast %67 : vector<1x8x8xf32> to vector<8x8xf32>
    %69 = arith.truncf %68 : vector<8x8xf32> to vector<8x8xbf16>
    %70 = arith.truncf %66 : vector<8x256xf32> to vector<8x256xbf16>
    %cst_27 = arith.constant dense<0.000000e+00> : vector<8x256xf32>
    %71 = tpu.matmul %69, %70, %cst_27 {dimension_numbers = #tpu.dot_dimension_numbers<[1], [0], [0], [1], [0, 0, 1, 1], [], []>} : vector<8x8xbf16>, vector<8x256xbf16>, vector<8x256xf32> -> vector<8x256xf32>
    %72 = arith.addf %56, %71 : vector<8x256xf32>
    %c4 = arith.constant 4 : index
    %c0_28 = arith.constant 0 : index
    %c0_29 = arith.constant 0 : index
    %73 = vector.load %arg3[%c4, %c0_28, %c0_29] : memref<9x8x8xf32, #tpu.memory_space<vmem>>, vector<1x8x8xf32>
    %74 = vector.shape_cast %73 : vector<1x8x8xf32> to vector<8x8xf32>
    %75 = arith.truncf %74 : vector<8x8xf32> to vector<8x8xbf16>
    %76 = arith.truncf %8 : vector<8x256xf32> to vector<8x256xbf16>
    %cst_30 = arith.constant dense<0.000000e+00> : vector<8x256xf32>
    %77 = tpu.matmul %75, %76, %cst_30 {dimension_numbers = #tpu.dot_dimension_numbers<[1], [0], [0], [1], [0, 0, 1, 1], [], []>} : vector<8x8xbf16>, vector<8x256xbf16>, vector<8x256xf32> -> vector<8x256xf32>
    %78 = arith.addf %72, %77 : vector<8x256xf32>
    %c240_i32_31 = arith.constant 240 : i32
    %79 = tpu.dynamic_rotate %8 by %c240_i32_31 dim 1 : vector<8x256xf32>, i32 -> vector<8x256xf32>
    %c16_i32_32 = arith.constant 16 : i32
    %80 = tpu.dynamic_rotate %8 by %c16_i32_32 dim 1 : vector<8x256xf32>, i32 -> vector<8x256xf32>
    %c240_i32_33 = arith.constant 240 : i32
    %81 = vector.broadcast %c240_i32_33 : i32 to vector<1x256xi32>
    %82 = arith.cmpi sge, %2, %81 : vector<1x256xi32>
    %c256_i32_34 = arith.constant 256 : i32
    %83 = vector.broadcast %c256_i32_34 : i32 to vector<1x256xi32>
    %84 = arith.cmpi slt, %2, %83 : vector<1x256xi32>
    %85 = arith.andi %82, %84 : vector<1x256xi1>
    %86 = vector.shape_cast %85 : vector<1x256xi1> to vector<1x256xi1>
    %87 = vector.broadcast %86 : vector<1x256xi1> to vector<8x256xi1>
    %88 = arith.select %87, %80, %79 : vector<8x256xi1>, vector<8x256xf32>
    %c7 = arith.constant 7 : index
    %c0_35 = arith.constant 0 : index
    %c0_36 = arith.constant 0 : index
    %89 = vector.load %arg3[%c7, %c0_35, %c0_36] : memref<9x8x8xf32, #tpu.memory_space<vmem>>, vector<1x8x8xf32>
    %90 = vector.shape_cast %89 : vector<1x8x8xf32> to vector<8x8xf32>
    %91 = arith.truncf %90 : vector<8x8xf32> to vector<8x8xbf16>
    %92 = arith.truncf %88 : vector<8x256xf32> to vector<8x256xbf16>
    %cst_37 = arith.constant dense<0.000000e+00> : vector<8x256xf32>
    %93 = tpu.matmul %91, %92, %cst_37 {dimension_numbers = #tpu.dot_dimension_numbers<[1], [0], [0], [1], [0, 0, 1, 1], [], []>} : vector<8x8xbf16>, vector<8x256xbf16>, vector<8x256xf32> -> vector<8x256xf32>
    %94 = arith.addf %78, %93 : vector<8x256xf32>
    %c255_i32_38 = arith.constant 255 : i32
    %95 = tpu.dynamic_rotate %8 by %c255_i32_38 dim 1 : vector<8x256xf32>, i32 -> vector<8x256xf32>
    %c1_i32_39 = arith.constant 1 : i32
    %96 = tpu.dynamic_rotate %8 by %c1_i32_39 dim 1 : vector<8x256xf32>, i32 -> vector<8x256xf32>
    %c15_i32_40 = arith.constant 15 : i32
    %97 = vector.broadcast %c15_i32_40 : i32 to vector<1x256xi32>
    %98 = arith.andi %2, %97 : vector<1x256xi32>
    %c15_i32_41 = arith.constant 15 : i32
    %99 = vector.broadcast %c15_i32_41 : i32 to vector<1x256xi32>
    %100 = arith.cmpi eq, %98, %99 : vector<1x256xi32>
    %101 = vector.shape_cast %100 : vector<1x256xi1> to vector<1x256xi1>
    %102 = vector.broadcast %101 : vector<1x256xi1> to vector<8x256xi1>
    %103 = arith.select %102, %96, %95 : vector<8x256xi1>, vector<8x256xf32>
    %c16_i32_42 = arith.constant 16 : i32
    %104 = tpu.dynamic_rotate %103 by %c16_i32_42 dim 1 : vector<8x256xf32>, i32 -> vector<8x256xf32>
    %c240_i32_43 = arith.constant 240 : i32
    %105 = tpu.dynamic_rotate %103 by %c240_i32_43 dim 1 : vector<8x256xf32>, i32 -> vector<8x256xf32>
    %c0_i32_44 = arith.constant 0 : i32
    %106 = vector.broadcast %c0_i32_44 : i32 to vector<1x256xi32>
    %107 = arith.cmpi sge, %2, %106 : vector<1x256xi32>
    %c16_i32_45 = arith.constant 16 : i32
    %108 = vector.broadcast %c16_i32_45 : i32 to vector<1x256xi32>
    %109 = arith.cmpi slt, %2, %108 : vector<1x256xi32>
    %110 = arith.andi %107, %109 : vector<1x256xi1>
    %111 = vector.shape_cast %110 : vector<1x256xi1> to vector<1x256xi1>
    %112 = vector.broadcast %111 : vector<1x256xi1> to vector<8x256xi1>
    %113 = arith.select %112, %105, %104 : vector<8x256xi1>, vector<8x256xf32>
    %c2 = arith.constant 2 : index
    %c0_46 = arith.constant 0 : index
    %c0_47 = arith.constant 0 : index
    %114 = vector.load %arg3[%c2, %c0_46, %c0_47] : memref<9x8x8xf32, #tpu.memory_space<vmem>>, vector<1x8x8xf32>
    %115 = vector.shape_cast %114 : vector<1x8x8xf32> to vector<8x8xf32>
    %116 = arith.truncf %115 : vector<8x8xf32> to vector<8x8xbf16>
    %117 = arith.truncf %113 : vector<8x256xf32> to vector<8x256xbf16>
    %cst_48 = arith.constant dense<0.000000e+00> : vector<8x256xf32>
    %118 = tpu.matmul %116, %117, %cst_48 {dimension_numbers = #tpu.dot_dimension_numbers<[1], [0], [0], [1], [0, 0, 1, 1], [], []>} : vector<8x8xbf16>, vector<8x256xbf16>, vector<8x256xf32> -> vector<8x256xf32>
    %119 = arith.addf %94, %118 : vector<8x256xf32>
    %c5 = arith.constant 5 : index
    %c0_49 = arith.constant 0 : index
    %c0_50 = arith.constant 0 : index
    %120 = vector.load %arg3[%c5, %c0_49, %c0_50] : memref<9x8x8xf32, #tpu.memory_space<vmem>>, vector<1x8x8xf32>
    %121 = vector.shape_cast %120 : vector<1x8x8xf32> to vector<8x8xf32>
    %122 = arith.truncf %121 : vector<8x8xf32> to vector<8x8xbf16>
    %123 = arith.truncf %103 : vector<8x256xf32> to vector<8x256xbf16>
    %cst_51 = arith.constant dense<0.000000e+00> : vector<8x256xf32>
    %124 = tpu.matmul %122, %123, %cst_51 {dimension_numbers = #tpu.dot_dimension_numbers<[1], [0], [0], [1], [0, 0, 1, 1], [], []>} : vector<8x8xbf16>, vector<8x256xbf16>, vector<8x256xf32> -> vector<8x256xf32>
    %125 = arith.addf %119, %124 : vector<8x256xf32>
    %c240_i32_52 = arith.constant 240 : i32
    %126 = tpu.dynamic_rotate %103 by %c240_i32_52 dim 1 : vector<8x256xf32>, i32 -> vector<8x256xf32>
    %c16_i32_53 = arith.constant 16 : i32
    %127 = tpu.dynamic_rotate %103 by %c16_i32_53 dim 1 : vector<8x256xf32>, i32 -> vector<8x256xf32>
    %c240_i32_54 = arith.constant 240 : i32
    %128 = vector.broadcast %c240_i32_54 : i32 to vector<1x256xi32>
    %129 = arith.cmpi sge, %2, %128 : vector<1x256xi32>
    %c256_i32_55 = arith.constant 256 : i32
    %130 = vector.broadcast %c256_i32_55 : i32 to vector<1x256xi32>
    %131 = arith.cmpi slt, %2, %130 : vector<1x256xi32>
    %132 = arith.andi %129, %131 : vector<1x256xi1>
    %133 = vector.shape_cast %132 : vector<1x256xi1> to vector<1x256xi1>
    %134 = vector.broadcast %133 : vector<1x256xi1> to vector<8x256xi1>
    %135 = arith.select %134, %127, %126 : vector<8x256xi1>, vector<8x256xf32>
    %c8 = arith.constant 8 : index
    %c0_56 = arith.constant 0 : index
    %c0_57 = arith.constant 0 : index
    %136 = vector.load %arg3[%c8, %c0_56, %c0_57] : memref<9x8x8xf32, #tpu.memory_space<vmem>>, vector<1x8x8xf32>
    %137 = vector.shape_cast %136 : vector<1x8x8xf32> to vector<8x8xf32>
    %138 = arith.truncf %137 : vector<8x8xf32> to vector<8x8xbf16>
    %139 = arith.truncf %135 : vector<8x256xf32> to vector<8x256xbf16>
    %cst_58 = arith.constant dense<0.000000e+00> : vector<8x256xf32>
    %140 = tpu.matmul %138, %139, %cst_58 {dimension_numbers = #tpu.dot_dimension_numbers<[1], [0], [0], [1], [0, 0, 1, 1], [], []>} : vector<8x8xbf16>, vector<8x256xbf16>, vector<8x256xf32> -> vector<8x256xf32>
    %141 = arith.addf %125, %140 : vector<8x256xf32>
    %cst_59 = arith.constant 0.000000e+00 : f32
    %142 = vector.broadcast %cst_59 : f32 to vector<8x256xf32>
    %143 = arith.maximumf %141, %142 : vector<8x256xf32>
    %c0_60 = arith.constant 0 : index
    %c0_61 = arith.constant 0 : index
    %144 = vector.load %arg4[%c0_60, %c0_61] : memref<16x8xf32, #tpu.memory_space<vmem>>, vector<16x8xf32>
    %145 = arith.truncf %144 : vector<16x8xf32> to vector<16x8xbf16>
    %146 = arith.truncf %143 : vector<8x256xf32> to vector<8x256xbf16>
    %cst_62 = arith.constant dense<0.000000e+00> : vector<16x256xf32>
    %147 = tpu.matmul %145, %146, %cst_62 {dimension_numbers = #tpu.dot_dimension_numbers<[1], [0], [0], [1], [0, 0, 1, 1], [], []>} : vector<16x8xbf16>, vector<8x256xbf16>, vector<16x256xf32> -> vector<16x256xf32>
    %cst_63 = arith.constant dense<0.000000e+00> : vector<16xf32>
    %148 = vector.multi_reduction <add>, %147, %cst_63 [1] : vector<16x256xf32> to vector<16xf32>
    %149 = vector.shape_cast %148 : vector<16xf32> to vector<16x1xf32>
    %cst_64 = arith.constant 2.560000e+02 : f32
    %150 = vector.broadcast %cst_64 : f32 to vector<16x1xf32>
    %151 = arith.divf %149, %150 : vector<16x1xf32>
    %c0_65 = arith.constant 0 : index
    %c0_66 = arith.constant 0 : index
    %152 = vector.load %arg5[%c0_65, %c0_66] : memref<16x4xf32, #tpu.memory_space<vmem>>, vector<16x4xf32>
    %153 = vector.broadcast %151 : vector<16x1xf32> to vector<16x4xf32>
    %154 = arith.mulf %152, %153 : vector<16x4xf32>
    %cst_67 = arith.constant dense<0.000000e+00> : vector<4xf32>
    %155 = vector.multi_reduction <add>, %154, %cst_67 [0] : vector<16x4xf32> to vector<4xf32>
    %156 = vector.shape_cast %155 : vector<4xf32> to vector<1x4xf32>
    %cst_68 = arith.constant 0.000000e+00 : f32
    %157 = vector.broadcast %cst_68 : f32 to vector<1x4xf32>
    %158 = arith.maximumf %156, %157 : vector<1x4xf32>
    %c0_69 = arith.constant 0 : index
    %c0_70 = arith.constant 0 : index
    %159 = vector.load %arg6[%c0_69, %c0_70] : memref<16x4xf32, #tpu.memory_space<vmem>>, vector<16x4xf32>
    %160 = vector.broadcast %158 : vector<1x4xf32> to vector<16x4xf32>
    %161 = arith.mulf %159, %160 : vector<16x4xf32>
    %cst_71 = arith.constant dense<0.000000e+00> : vector<16xf32>
    %162 = vector.multi_reduction <add>, %161, %cst_71 [1] : vector<16x4xf32> to vector<16xf32>
    %163 = vector.shape_cast %162 : vector<16xf32> to vector<16x1xf32>
    %164 = arith.negf %163 : vector<16x1xf32>
    %165 = math.exp %164 : vector<16x1xf32>
    %cst_72 = arith.constant 1.000000e+00 : f32
    %166 = vector.broadcast %cst_72 : f32 to vector<16x1xf32>
    %167 = arith.addf %166, %165 : vector<16x1xf32>
    %168 = arith.divf %166, %167 : vector<16x1xf32>
    %169 = vector.broadcast %168 : vector<16x1xf32> to vector<16x256xf32>
    %170 = arith.mulf %147, %169 : vector<16x256xf32>
    %171 = arith.addf %1, %170 : vector<16x256xf32>
    %c0_73 = arith.constant 0 : index
    %c0_74 = arith.constant 0 : index
    %c0_75 = arith.constant 0 : index
    %172 = vector.load %arg7[%c0_73, %c0_74, %c0_75] : memref<1x16x256xf32, #tpu.memory_space<vmem>>, vector<1x16x256xf32>
    %173 = vector.shape_cast %172 : vector<1x16x256xf32> to vector<16x256xf32>
    %174 = vector.shape_cast %171 : vector<16x256xf32> to vector<1x16x256xf32>
    tpu.vector_store %arg7[%c0_73, %c0_74, %c0_75], %174 {strides = array<i32>} : memref<1x16x256xf32, #tpu.memory_space<vmem>>, vector<1x16x256xf32>,
    return
  }
  func.func @transform_0(%arg0: i32) -> (i32, i32, i32) {
    %c0_i32 = arith.constant 0 : i32
    %c0_i32_0 = arith.constant 0 : i32
    %c0_i32_1 = arith.constant 0 : i32
    return %arg0, %c0_i32, %c0_i32_0 : i32, i32, i32
  }
  func.func @transform_1(%arg0: i32) -> (i32, i32) {
    %c0_i32 = arith.constant 0 : i32
    %c0_i32_0 = arith.constant 0 : i32
    %c0_i32_1 = arith.constant 0 : i32
    return %c0_i32, %c0_i32_0 : i32, i32
  }
  func.func @transform_2(%arg0: i32) -> (i32, i32, i32) {
    %c0_i32 = arith.constant 0 : i32
    %c0_i32_0 = arith.constant 0 : i32
    %c0_i32_1 = arith.constant 0 : i32
    %c0_i32_2 = arith.constant 0 : i32
    return %c0_i32, %c0_i32_0, %c0_i32_1 : i32, i32, i32
  }
  func.func @transform_3(%arg0: i32) -> (i32, i32) {
    %c0_i32 = arith.constant 0 : i32
    %c0_i32_0 = arith.constant 0 : i32
    %c0_i32_1 = arith.constant 0 : i32
    return %c0_i32, %c0_i32_0 : i32, i32
  }
  func.func @transform_4(%arg0: i32) -> (i32, i32) {
    %c0_i32 = arith.constant 0 : i32
    %c0_i32_0 = arith.constant 0 : i32
    %c0_i32_1 = arith.constant 0 : i32
    return %c0_i32, %c0_i32_0 : i32, i32
  }
  func.func @transform_5(%arg0: i32) -> (i32, i32) {
    %c0_i32 = arith.constant 0 : i32
    %c0_i32_0 = arith.constant 0 : i32
    %c0_i32_1 = arith.constant 0 : i32
    return %c0_i32, %c0_i32_0 : i32, i32
  }
  func.func @transform_6(%arg0: i32) -> (i32, i32, i32) {
    %c0_i32 = arith.constant 0 : i32
    %c0_i32_0 = arith.constant 0 : i32
    %c0_i32_1 = arith.constant 0 : i32
    return %arg0, %c0_i32, %c0_i32_0 : i32, i32, i32
  }
}

</mosaic_0001>

<bundles_post_ra>
// kernel: tpu_custom_call.1
= control target key start
LH: loop header
LB: loop body
LE: loop exit
PB: predicated region body
PF: predicated region fallthrough
CT: control target
= control target key end

     0   :  { %11 = vsyncpa [#allocation3], 0  ;;  %s1688_s0 = inlined_call_operand.vmem [shape: f32[2,16,256], index: 0, kind: input, shape index: {}]   ;;  %s1689_s1 = inlined_call_operand.vmem [shape: f32[8,16], index: 1, kind: input, shape index: {}]   ;;  %s1690_s2 = inlined_call_operand.vmem [shape: f32[9,8,8], index: 2, kind: input, shape index: {}]   ;;  %s1691_s3 = inlined_call_operand.vmem [shape: f32[16,8], index: 3, kind: input, shape index: {}]   ;;  %s1692_s4 = inlined_call_operand.vmem [shape: f32[16,4], index: 4, kind: input, shape index: {}]   ;;  %s1693_s5 = inlined_call_operand.vmem [shape: f32[16,4], index: 5, kind: input, shape index: {}]   ;;  %s1694_s6 = inlined_call_operand.hbm [shape: f32[2,16,256], index: 6, kind: output, shape index: {}]  }
   0x1   :  { %13 = vsyncpa [#allocation3 + $0x1], 0  ;;  %s1387_s21 = smov 0   ;;  %s1389_s22 = smov 0  }
   0x2   :  { %s1391_s23 = smov 0   ;;  %s1393_s24 = smov 0  }
   0x3 LB: > { %s1408_s25 = sadd.s32 4294967295, %s1343_s24   ;;  %s1113_s26 = sadd.s32 4294967294, %s1343_s24   ;;  %s1343_s24 = sphi %s1393_s24, %s1702_s24   ;;  %s1339_s23 = sphi %s1391_s23, %s1701_s23   ;;  %s1335_s22 = sphi %s1389_s22, %s1700_s22   ;;  %s1331_s21 = sphi %s1387_s21, %s1699_s21  }
   0x4   : > { %s1412_s27 = sadd.s32 1, %s1343_s24   ;;  %s157_s28 = sadd.s32 1, %s1339_s23 }
   0x5   : > { %s154_s29 = ssub.s32 %s1343_s24, %s1412_s27  ;;  %p167_p0 = scmp.ne.s32.totalorder %s1339_s23, %s1335_s22 }
   0x6   : > { %p155_p1 = scmp.eq.s32.totalorder %s154_s29, 0  ;;  %p168_p2 = scmp.eq.s32.totalorder %s1408_s25, 1 }
   0x7   : > { %p173_p3 = scmp.ne.s32.totalorder %s1335_s22, %s1331_s21  ;;  %p174_p4 = scmp.eq.s32.totalorder %s1113_s26, 1 }
   0x8   : > { %s1423_s30 = scalar_select %p155_p1, %s1339_s23, %s157_s28  }
   0x9   : > { %p1425_p5 = por %p168_p2, %p167_p0  ;;  %p1429_p6 = por %p174_p4, %p173_p3 }
   0xa   : > { %p1116_p7 = scmp.ge.s32.totalorder %s1343_s24, 1  ;;  %p215_p8 = scmp.lt.s32.totalorder %s1343_s24, 3 }
   0xc   : > { %p216_p9 = pnand %p1116_p7, %p215_p8 }
   0xd   : > { %p245_p10 = scmp.lt.s32.totalorder (!%p216_p9), %s1408_s25, 1  ;;  %v1345_v0 = vmov (!%p216_p9), 0   ;;  %v258_v1 = vld [vmem:[%s1689_s1] sm:$0xff] (!%p216_p9)  ;;  %vm262_vm0 = vcmask (!%p216_p9), 130048   ;;  %s1346_s16 = smov (!%p216_p9), 16   ;;  %v255_v16 = vlaneseq (!%p216_p9)  ;;  %vm371_vm2 = vcmask (!%p216_p9), 1043456  }
   0xe   : > { %219 = sbr.rel (%p216_p9) target bundleno = 1320 (0x528), region = 44  ;;  %298 = vmatprep.mubr.bf16.mxu0 (!%p216_p9), %v1345_v0  ;;  %598 = vmatprep.mubr.bf16.mxu1 (!%p216_p9), %v1345_v0  ;;  %v259_v8 = vpack.c.bf16 (!%p216_p9), %v258_v1, %v258_v1  ;;  %s1347_s17 = smov (!%p216_p9), 1   ;;  %v1129_v47 = vld [vmem:[%s1690_s2 + $0x8] sm:$0xff] (!%p216_p9)  ;;  %v1121_v50 = vld [vmem:[%s1690_s2 + $0x18] sm:$0xff] (!%p216_p9)  ;;  %vm367_vm11 = vcmask (!%p216_p9), 64512   ;;  %v1132_v1 = vld [vmem:[%s1690_s2 + $0x20] sm:$0xff] (!%p216_p9) }
   0xf   : > { %s1348_s18 = smov (!%p216_p9), 112   ;;  %s1349_s19 = smov (!%p216_p9), 127   ;;  %v1466_v17 = vand.u32 (!%p216_p9), 127, %v255_v16  ;;  %v554_v55 = vpack.c.bf16 (!%p216_p9), %v1129_v47, %v1129_v47  ;;  %v364_v60 = vpack.c.bf16 (!%p216_p9), %v1121_v50, %v1121_v50  ;;  %vm992_vm12 = vcmask (!%p216_p9), 31744  }
  0x10   : > { %s242_s28 = sand.u32 (!%p216_p9), 1, %s1335_s22  }
  0x11   : > { %v1469_v18 = vadd.s32 (!%p216_p9), 128, %v1466_v17  ;;  %vm337_vm1 = vcmp.lt.s32.totalorder (!%p216_p9), %v1466_v17, 16  ;;  %v323_v22 = vand.u32 (!%p216_p9), 15, %v1466_v17  ;;  %vm313_vm3 = vcmp.lt.s32.totalorder (!%p216_p9), %v1466_v17, 1  ;;  %s1117_s29 = sshll.u32 (!%p216_p9), %s242_s28, 5 }
  0x12   : > { %vm344_vm4 = vcmp.lt.s32.totalorder (!%p216_p9), %v1466_v17, 112  ;;  %vm320_vm5 = vcmp.lt.s32.totalorder (!%p216_p9), %v1466_v17, 127 }
  0x13   : > { %v324_v21 = vand.u32 (!%p216_p9), 15, %v1469_v18  ;;  %vm725_vm7 = vcmp.eq.s32.totalorder (!%p216_p9), %v323_v22, 15  ;;  %vm325_vm9 = vcmp.eq.s32.totalorder (!%p216_p9), %v323_v22, 0  ;;  %vm470_vm10 = vcmp.ge.s32.totalorder (!%p216_p9), %v1469_v18, 240  ;;  %v1138_v22 = vld [vmem:[%s1690_s2 + $0x10] sm:$0xff] (!%p216_p9) }
  0x15   : > { %s246_s9 = scalar_select %p245_p10, %s1408_s25, 1  ;;  %vm1479_vm6 = vcmp.eq.s32.totalorder %v324_v21, 0  ;;  %vm726_vm8 = vcmp.eq.s32.totalorder %v324_v21, 15 }
  0x17   : > { %s1156_s10 = sshll.u32 %s246_s9, 5  ;;  %s1157_s9 = sshll.u32 %s1408_s25, 9 }
  0x18   : > { %s249_s13 = scalar_lea.vmem %s1688_s0, %s1156_s10  ;;  %s244_s10 = scalar_lea.vmem [#allocation2], %s1117_s29 }
  0x19   : > { %v1445_v2 = vld [vmem:[%s249_s13 + $0x8] sm:$0xff]  ;;  %v1447_v3 = vld [vmem:[%s249_s13 + $0x18] sm:$0xff]  ;;  %v1449_v4 = vld [vmem:[%s249_s13] sm:$0xff]  ;;  %s1051_s11 = sshll.u32 %s244_s10, 4  ;;  %s1640_s14 = scalar_lea.hbm %s1694_s6, %s1157_s9  ;;  %s1644_s11 = int_to_ptr.vmem [resolvable:$true] %s1051_s11 }
  0x1a   : > { %v261_v5 = vpack.c.bf16 %v1447_v3, %v1445_v2  ;;  %v1453_v6 = vld [vmem:[%s249_s13 + $0x10] sm:$0xff]  ;;  %s1646_s25 = scalar_lea.sflag [#allocation3], %s242_s28  ;;  %s1281_s15 = scalar_lea.vmem %s1644_s11, 512 }
  0x1b   : > { %v260_v7 = vpack.c.bf16 %v1453_v6, %v1449_v4  ;;  %p1282_p11 = scmp.ne.s32.totalorder %s1644_s11, %s1281_s15 }
  0x1c   : > { %266 = vmatprep.subr.bf16.mxu0 %v261_v5  ;;  %v611_v5 = vpack.c.bf16 %v1132_v1, %v1132_v1 }
  0x1d   : > { %267 = vmatpush1.bf16.msra.mxu0 %v260_v7  ;;  %p1283_p12 = pnand %p1282_p11, %p1425_p5 }
  0x1f   : > { %p1284_p13 = pneg %p1283_p12 }
  0x20   : > { %1120 = vmatmul.mubr.msk.bf16.vlgmr.msra.gmra.mrb[0].mxu0 %vm262_vm0, %v259_v8 }
  0x21   : > { %410 = vmatprep.mubr.bf16.mxu0 %v1345_v0 }
  0xf3   : > { %v300_v9 = vpop.f32.mrb[0].mxu0 }
  0xf4   : > { %v1458_v10 = vmax.f32 %v300_v9, 0.0  ;;  %v302_v11 = vpop.f32.mrb[1].mxu0  ;;  %v1135_v9 = vld [vmem:[%s1690_s2 + $0x38] sm:$0xff] }
  0xf5   : > { %v1460_v12 = vmax.f32 %v302_v11, 0.0  ;;  %v304_v13 = vpop.f32.mrb[2].mxu0 }
  0xf6   : > { %v305_v14 = vpop.f32.mrb[3].mxu0  ;;  %v612_v56 = vpack.c.bf16 %v1458_v10, %v1458_v10 }
  0xf7   : > { %v1243_v15 = vpack.i.bf16 %v1460_v12, %v1458_v10  ;;  %v613_v54 = vpack.c.bf16 %v1460_v12, %v1460_v12  ;;  %v670_v10 = vpack.c.bf16 %v1135_v9, %v1135_v9 }
  0xf8   : > { %v618_v63 = vsel %vm371_vm2, %v612_v56, 0 }
  0xf9   : > { %1244 = vrot.lane.b32.xlu1 %v1243_v15, %s1346_s16  ;;  %1234 = vrot.lane.b32.xlu0 %v1243_v15, %s1347_s17  ;;  %s1350_s17 = smov [#allocation2]  }
  0xfd   : > { %1249 = vrot.lane.b32.xlu1 %v1243_v15, %s1348_s18  ;;  %1239 = vrot.lane.b32.xlu0 %v1243_v15, %s1349_s19 }
 0x16b   : > { %v1245_v19 = vpop.permute.xlu1 %1244  ;;  %v1235_v20 = vpop.permute.xlu0 %1234 }
 0x16c   : > { %v1247_v23 = vunpack.i.h.bf16 %v1245_v19  ;;  %v1246_v24 = vunpack.i.l.bf16 %v1245_v19  ;;  %v1237_v25 = vunpack.i.h.bf16 %v1235_v20  ;;  %v1236_v26 = vunpack.i.l.bf16 %v1235_v20 }
 0x16e   : > { %v542_v27 = vsel %vm337_vm1, %v1246_v24, %v1247_v23  ;;  %v314_v36 = vsel %vm313_vm3, %v1236_v26, %v1237_v25  ;;  %v315_v37 = vsel %vm313_vm3, %v1237_v25, %v1236_v26  ;;  %v543_v46 = vsel %vm337_vm1, %v1247_v23, %v1246_v24 }
 0x16f   : > { %v1250_v28 = vpop.permute.xlu1 %1249  ;;  %v1240_v30 = vpop.permute.xlu0 %1239  ;;  %v556_v31 = vpack.c.bf16 %v542_v27, %v542_v27 }
 0x170   : > { %v1252_v32 = vunpack.i.h.bf16 %v1250_v28  ;;  %v1251_v33 = vunpack.i.l.bf16 %v1250_v28  ;;  %v1242_v34 = vunpack.i.h.bf16 %v1240_v30  ;;  %v1241_v35 = vunpack.i.l.bf16 %v1240_v30 }
 0x171   : > { %1130 = vmatprep.subr.msk.bf16.mxu1 %vm371_vm2, %v556_v31 }
 0x172   : > { %v321_v38 = vsel %vm320_vm5, %v1241_v35, %v1242_v34  ;;  %v322_v39 = vsel %vm320_vm5, %v1242_v34, %v1241_v35  ;;  %v548_v40 = vsel %vm344_vm4, %v1251_v33, %v1252_v32  ;;  %v549_v51 = vsel %vm344_vm4, %v1252_v32, %v1251_v33 }
 0x173   : > { %v332_v41 = vsel %vm1479_vm6, %v322_v39, %v314_v36  ;;  %v1496_v42 = vsel %vm725_vm7, %v315_v37, %v321_v38  ;;  %v1498_v43 = vsel %vm726_vm8, %v314_v36, %v322_v39  ;;  %v331_v48 = vsel %vm325_vm9, %v321_v38, %v315_v37 }
 0x174   : > { %v1258_v44 = vpack.i.bf16 %v1498_v43, %v1496_v42  ;;  %v366_v45 = vpack.c.bf16 %v332_v41, %v332_v41  ;;  %v550_v49 = vsel %vm337_vm1, %v548_v40, %v543_v46  ;;  %v365_v52 = vpack.c.bf16 %v331_v48, %v331_v48 }
 0x175   : > { %v555_v53 = vpack.c.bf16 %v550_v49, %v550_v49  ;;  %v1268_v59 = vpack.i.bf16 %v332_v41, %v331_v48  ;;  %v667_v61 = vsel %vm470_vm10, %v542_v27, %v549_v51  ;;  %v671_v7 = vpack.c.bf16 %v548_v40, %v548_v40 }
 0x176   : > { %1259 = vrot.lane.b32.xlu1 %v1258_v44, %s1348_s18  ;;  %1254 = vrot.lane.b32.xlu0 %v1258_v44, %s1346_s16  ;;  %v373_v57 = vsel %vm371_vm2, %v365_v52, 0  ;;  %v672_v62 = vpack.c.bf16 %v667_v61, %v667_v61  ;;  %v808_v33 = vpack.c.bf16 %v1498_v43, %v1498_v43  ;;  %v749_v34 = vpack.c.bf16 %v1138_v22, %v1138_v22  ;;  %v1141_v52 = vld [vmem:[%s1690_s2 + $0x28] sm:$0xff] }
 0x177   : > { %1122 = vmatprep.subr.msk.bf16.mxu0 %vm371_vm2, %v366_v45  ;;  %v561_v58 = vsel %vm371_vm2, %v555_v53, 0  ;;  %v677_v8 = vsel %vm371_vm2, %v671_v7, 0  ;;  %v807_v38 = vpack.c.bf16 %v1496_v42, %v1496_v42  ;;  %v358_v42 = vld [vmem:[%s1690_s2] sm:$0xff]  ;;  %v806_v53 = vpack.c.bf16 %v1141_v52, %v1141_v52 }
 0x178   : > { %379 = vmatpush1.bf16.msra.mxu0 %v373_v57  ;;  %567 = vmatpush1.bf16.msra.mxu1 %v561_v58  ;;  %v359_v50 = vpack.c.bf16 %v358_v42, %v358_v42  ;;  %v1144_v58 = vld [vmem:[%s1690_s2 + $0x40] sm:$0xff]  ;;  %v1004_v42 = vld [vmem:[%s1693_s5 + $0x8] sm:$0xff] }
 0x179   : > { %1133 = vmatprep.subr.msk.bf16.mxu1 %vm371_vm2, %v613_v54  ;;  %v813_v47 = vsel %vm371_vm2, %v807_v38, 0 }
 0x17a   : > { %1269 = vrot.lane.b32.xlu1 %v1268_v59, %s1348_s18  ;;  %1264 = vrot.lane.b32.xlu0 %v1268_v59, %s1346_s16  ;;  %v865_v59 = vpack.c.bf16 %v1144_v58, %v1144_v58  ;;  %s1285_s18 = sshll.u32 %s1350_s17, 4  ;;  %s1286_s18 = int_to_ptr.vmem [resolvable:$false] %s1285_s18 }
 0x17b   : > { %1131 = vmatmul.mubr.msk.bf16.vlgmr.msra.gmra.mrb[0].mxu1 %vm367_vm11, %v554_v55  ;;  %1123 = vmatmul.mubr.msk.bf16.vlgmr.msra.gmra.mrb[4].mxu0 %vm367_vm11, %v364_v60  ;;  %v1126_v55 = vld [vmem:[%s1690_s2 + $0x30] sm:$0xff]  ;;  %s1287_s19 = scalar_lea.vmem %s1286_s18, 1024  ;;  %p1288_p0 = scmp.lt.s32.totalorder %s1644_s11, %s1286_s18 }
 0x17c   : > { %624 = vmatpush1.bf16.msra.mxu1 %v618_v63  ;;  %655 = vmatprep.mubr.bf16.mxu1 %v1345_v0  ;;  %v483_v57 = vpack.c.bf16 %v1126_v55, %v1126_v55  ;;  %p1289_p1 = scmp.lt.s32.totalorder %s1287_s19, %s1281_s15 }
 0x17d   : > { %1136 = vmatprep.subr.msk.bf16.mxu1 %vm371_vm2, %v672_v62  ;;  %460 = vmatprep.mubr.bf16.mxu0 %v1345_v0 }
 0x17e   : > { %p1290_p2 = por %p1289_p1, %p1288_p0 }
 0x180   : > { %p1291_p3 = pnand %p1290_p2, %p1284_p13 }
 0x187   : > { %1134 = vmatmul.mubr.msk.bf16.vlgmr.msra.gmra.mrb[0].mxu1 %vm367_vm11, %v611_v5 }
 0x188   : > { %683 = vmatpush1.bf16.msra.mxu1 %v677_v8  ;;  %714 = vmatprep.mubr.bf16.mxu1 %v1345_v0 }
 0x193   : > { %1137 = vmatmul.mubr.msk.bf16.vlgmr.msra.gmra.mrb[0].mxu1 %vm367_vm11, %v670_v10 }
 0x194   : > { %793 = vmatprep.mubr.bf16.mxu1 %v1345_v0 }
 0x1e8   : > { %v1260_v11 = vpop.permute.xlu1 %1259  ;;  %v1255_v12 = vpop.permute.xlu0 %1254 }
 0x1e9   : > { %v1262_v13 = vunpack.i.h.bf16 %v1260_v11  ;;  %v1261_v14 = vunpack.i.l.bf16 %v1260_v11  ;;  %v1257_v15 = vunpack.i.h.bf16 %v1255_v12  ;;  %v1256_v16 = vunpack.i.l.bf16 %v1255_v12 }
 0x1eb   : > { %v743_v19 = vsel %vm344_vm4, %v1261_v14, %v1262_v13  ;;  %v737_v20 = vsel %vm337_vm1, %v1256_v16, %v1257_v15  ;;  %v738_v21 = vsel %vm337_vm1, %v1257_v15, %v1256_v16  ;;  %v744_v26 = vsel %vm344_vm4, %v1262_v13, %v1261_v14  ;;  %v923_v14 = vld [vmem:[%s1691_s3 + $0x8] sm:$0xff] }
 0x1ec   : > { %v751_v23 = vpack.c.bf16 %v737_v20, %v737_v20  ;;  %v1270_v24 = vpop.permute.xlu1 %1269  ;;  %v745_v25 = vsel %vm337_vm1, %v743_v19, %v738_v21  ;;  %v1265_v29 = vpop.permute.xlu0 %1264  ;;  %v862_v41 = vsel %vm470_vm10, %v737_v20, %v744_v26  ;;  %v866_v54 = vpack.c.bf16 %v743_v19, %v743_v19  ;;  %v988_v26 = vld [vmem:[%s1692_s4] sm:$0xff] }
 0x1ed   : > { %v1272_v27 = vunpack.i.h.bf16 %v1270_v24  ;;  %v1271_v28 = vunpack.i.l.bf16 %v1270_v24  ;;  %v750_v30 = vpack.c.bf16 %v745_v25, %v745_v25  ;;  %v1267_v31 = vunpack.i.h.bf16 %v1265_v29 }
 0x1ee   : > { %v1266_v32 = vunpack.i.l.bf16 %v1265_v29  ;;  %1139 = vmatprep.subr.msk.bf16.mxu1 %vm371_vm2, %v751_v23  ;;  %v867_v48 = vpack.c.bf16 %v862_v41, %v862_v41  ;;  %v872_v56 = vsel %vm371_vm2, %v866_v54, 0  ;;  %v989_v29 = vld [vmem:[%s1692_s4 + $0x8] sm:$0xff] }
 0x1ef   : > { %v345_v35 = vsel %vm344_vm4, %v1271_v28, %v1272_v27  ;;  %v346_v36 = vsel %vm344_vm4, %v1272_v27, %v1271_v28  ;;  %v756_v37 = vsel %vm371_vm2, %v750_v30, 0 }
 0x1f0   : > { %v338_v39 = vsel %vm337_vm1, %v1266_v32, %v1267_v31  ;;  %v339_v40 = vsel %vm337_vm1, %v1267_v31, %v1266_v32  ;;  %762 = vmatpush1.bf16.msra.mxu1 %v756_v37  ;;  %v484_v51 = vpack.c.bf16 %v345_v35, %v345_v35 }
 0x1f1   : > { %v361_v43 = vpack.c.bf16 %v338_v39, %v338_v39  ;;  %1142 = vmatprep.subr.msk.bf16.mxu1 %vm371_vm2, %v808_v33  ;;  %v356_v44 = vsel %vm337_vm1, %v345_v35, %v339_v40  ;;  %v480_v45 = vsel %vm470_vm10, %v338_v39, %v346_v36 }
 0x1f2   : > { %v360_v46 = vpack.c.bf16 %v356_v44, %v356_v44  ;;  %v485_v17 = vpack.c.bf16 %v480_v45, %v480_v45  ;;  %v490_v18 = vsel %vm371_vm2, %v484_v51, 0  ;;  %v1003_v44 = vld [vmem:[%s1693_s5] sm:$0xff] }
 0x1f3   : > { %1124 = vmatprep.subr.msk.bf16.mxu0 %vm371_vm2, %v361_v43  ;;  %1140 = vmatmul.mubr.msk.bf16.vlgmr.msra.gmra.mrb[0].mxu1 %vm367_vm11, %v749_v34 }
 0x1f4   : > { %v423_v49 = vsel %vm371_vm2, %v360_v46, 0  ;;  %819 = vmatpush1.bf16.msra.mxu1 %v813_v47  ;;  %850 = vmatprep.mubr.bf16.mxu1 %v1345_v0 }
 0x1f5   : > { %429 = vmatpush1.bf16.msra.mxu0 %v423_v49  ;;  %1145 = vmatprep.subr.msk.bf16.mxu1 %vm371_vm2, %v867_v48 }
 0x1f6   : > { %1127 = vmatprep.subr.msk.bf16.mxu0 %vm371_vm2, %v485_v17 }
 0x1f8   : > { %1125 = vmatmul.mubr.msk.bf16.vlgmr.msra.gmra.mrb[4].mxu0 %vm367_vm11, %v359_v50 }
 0x1f9   : > { %496 = vmatpush1.bf16.msra.mxu0 %v490_v18  ;;  %527 = vmatprep.mubr.bf16.mxu0 %v1345_v0 }
 0x1ff   : > { %1143 = vmatmul.mubr.msk.bf16.vlgmr.msra.gmra.mrb[0].mxu1 %vm367_vm11, %v806_v53 }
 0x200   : > { %878 = vmatpush1.bf16.msra.mxu1 %v872_v56  ;;  %909 = vmatprep.mubr.bf16.mxu1 %v1345_v0 }
 0x204   : > { %1128 = vmatmul.mubr.msk.bf16.vlgmr.msra.gmra.mrb[4].mxu0 %vm367_vm11, %v483_v57 }
 0x205   : > { %968 = vmatprep.mubr.bf16.mxu0 %v1345_v0  ;;  %v922_v0 = vld [vmem:[%s1691_s3] sm:$0xff] }
 0x206   : > { %v924_v19 = vpack.c.bf16 %v923_v14, %v922_v0 }
 0x20b   : > { %1146 = vmatmul.mubr.msk.bf16.vlgmr.msra.gmra.mrb[0].mxu1 %vm367_vm11, %v865_v59 }
 0x2d7   : > { %v529_v60 = vpop.f32.mrb[4].mxu0 }
 0x2d8   : > { %v531_v61 = vpop.f32.mrb[5].mxu0 }
 0x2d9   : > { %v533_v62 = vpop.f32.mrb[6].mxu0 }
 0x2da   : > { %v534_v63 = vpop.f32.mrb[7].mxu0 }
 0x2de   : > { %v911_v1 = vpop.f32.mrb[0].mxu1 }
 0x2df   : > { %v1158_v5 = vadd.f32 %v911_v1, %v529_v60  ;;  %v913_v7 = vpop.f32.mrb[1].mxu1 }
 0x2e0   : > { %v1159_v8 = vadd.f32 %v913_v7, %v531_v61  ;;  %v915_v9 = vpop.f32.mrb[2].mxu1 }
 0x2e1   : > { %v920_v10 = vmax.f32 %v1158_v5, 0.0  ;;  %v916_v11 = vpop.f32.mrb[3].mxu1 }
 0x2e2   : > { %v921_v12 = vmax.f32 %v1159_v8, 0.0 }
 0x2e3   : > { %v925_v13 = vpack.c.bf16 %v920_v10, %v920_v10 }
 0x2e4   : > { %v926_v15 = vpack.c.bf16 %v921_v12, %v921_v12 }
 0x2e5   : > { %v931_v16 = vsel %vm371_vm2, %v925_v13, 0 }
 0x2e6   : > { %1147 = vmatprep.subr.msk.bf16.mxu0 %vm371_vm2, %v926_v15 }
 0x2e7   : > { %937 = vmatpush1.bf16.msra.mxu0 %v931_v16 }
 0x2ea   : > { %1148 = vmatmul.mubr.msk.bf16.vlgmr.msra.gmra.mrb[8].mxu0 %vm367_vm11, %v924_v19 }
 0x3bd   : > { %v970_v20 = vpop.f32.mrb[8].mxu0 }
 0x3be   : > { %v972_v21 = vpop.f32.mrb[9].mxu0 }
 0x3bf   : > { %v974_v22 = vpop.f32.mrb[10].mxu0  ;;  %v979_v23 = vadd.f32 %v972_v21, %v970_v20 }
 0x3c0   : > { %v976_v24 = vpop.f32.mrb[11].mxu0 }
 0x3c1   : > { %v982_v25 = vadd.f32 %v976_v24, %v974_v22  ;;  %980 = vadd.xlane.f32.xlu0 %v979_v23 }
 0x3c3   : > { %983 = vadd.xlane.f32.xlu1 %v982_v25 }
 0x44e   : > { %v981_v27 = vpop.xlane.xlu0 %980 }
 0x44f   : > { %v986_v28 = vmul.f32 0.00390625, %v981_v27 }
 0x450   : > { %v984_v30 = vpop.xlane.xlu1 %983 }
 0x451   : > { %v990_v31 = vmul.f32 %v988_v26, %v986_v28  ;;  %v987_v32 = vmul.f32 0.00390625, %v984_v30 }
 0x453   : > { %v991_v33 = vmul.f32 %v989_v29, %v987_v32  ;;  %v993_v34 = vsel %vm992_vm12, %v990_v31, 0.0 }
 0x455   : > { %v994_v35 = vsel %vm992_vm12, %v991_v33, 0.0 }
 0x456   : > { %v995_v36 = vadd.f32 %v994_v35, %v993_v34 }
 0x458   : > { %v996_v37 = vrot.slane %v995_v36, 4 }
 0x45a   : > { %v997_v38 = vadd.f32 %v996_v37, %v995_v36 }
 0x45c   : > { %v998_v39 = vrot.slane %v997_v38, 2 }
 0x45e   : > { %v999_v40 = vadd.f32 %v998_v39, %v997_v38 }
 0x460   : > { %v1000_v41 = vrot.slane %v999_v40, 1 }
 0x462   : > { %v1001_v43 = vadd.f32 %v1000_v41, %v999_v40 }
 0x464   : > { %v1002_v45 = vmax.f32 %v1001_v43, 0.0 }
 0x466   : > { %v1005_v46 = vmul.f32 %v1003_v44, %v1002_v45  ;;  %v1006_v48 = vmul.f32 %v1004_v42, %v1002_v45 }
 0x468   : > { %v1007_v47 = vsel %vm992_vm12, %v1005_v46, 0.0  ;;  %v1010_v49 = vsel %vm992_vm12, %v1006_v48, 0.0 }
 0x469   : > { %1008 = vadd.xlane.f32.xlu0 %v1007_v47 }
 0x46d   : > { %1011 = vadd.xlane.f32.xlu0 %v1010_v49 }
 0x4f6   : > { %v1009_v17 = vpop.xlane.xlu0 %1008 }
 0x4f7   : > { %v1149_v50 = vmul.f32 -1.442695, %v1009_v17 }
 0x4f9   : > { %1273 = vpow2.f32 %v1149_v50 }
 0x4fa   : > { %v1012_v51 = vpop.xlane.xlu0 %1011 }
 0x4fb   : > { %v1150_v18 = vmul.f32 -1.442695, %v1012_v51 }
 0x4fd   : > { %1275 = vpow2.f32 %v1150_v18 }
 0x503   : > { %v1274_v52 = vpop.eup %1273 }
 0x504   : > { %v1019_v53 = vadd.f32 1.0, %v1274_v52 }
 0x506   : > { %1277 = vrcp.f32 %v1019_v53 }
 0x507   : > { %v1276_v54 = vpop.eup %1275 }
 0x508   : > { %v1020_v55 = vadd.f32 1.0, %v1276_v54 }
 0x50a   : > { %1279 = vrcp.f32 %v1020_v55 }
 0x510   : > { %v1278_v56 = vpop.eup %1277 }
 0x511   : > { %v1025_v57 = vmul.f32 %v1278_v56, %v970_v20  ;;  %v1026_v58 = vmul.f32 %v1278_v56, %v972_v21 }
 0x513   : > { %v1029_v59 = vadd.f32 %v1025_v57, %v1449_v4  ;;  %v1030_v60 = vadd.f32 %v1026_v58, %v1445_v2 }
 0x514   : > { %v1280_v61 = vpop.eup %1279 }
 0x515   : > { %1033 = vst [vmem:[%s244_s10] sm:$0xff] %v1029_v59  ;;  %1034 = vst [vmem:[%s244_s10 + $0x8] sm:$0xff] %v1030_v60  ;;  %v1027_v62 = vmul.f32 %v1280_v61, %v974_v22  ;;  %v1028_v63 = vmul.f32 %v1280_v61, %v976_v24 }
 0x517   : > { %v1031_v1 = vadd.f32 %v1027_v62, %v1453_v6  ;;  %v1032_v4 = vadd.f32 %v1028_v63, %v1447_v3 }
 0x519   : > { %1035 = vst [vmem:[%s244_s10 + $0x10] sm:$0xff] %v1031_v1  ;;  %1036 = vst [vmem:[%s244_s10 + $0x18] sm:$0xff] %v1032_v4 }
 0x51a   : > { %1294 = shalt.err (!%p1291_p3)
}
 0x51b   : > { %s1295_s20 = scalar_lea.hbm %s1640_s14, 512  ;;  %s1299_s29 = scalar_lea.hbm %s1694_s6, 1024 }
 0x51c   : > { %p1296_p4 = scmp.ne.s32.totalorder %s1640_s14, %s1295_s20  ;;  %p1300_p9 = scmp.lt.u32.totalorder %s1640_s14, %s1694_s6 }
 0x51d   : > { %p1301_p10 = scmp.lt.u32.totalorder %s1299_s29, %s1295_s20  ;;  %p1303_p12 = scmp.lt.u32.totalorder %s1295_s20, %s1640_s14 }
 0x51e   : > { %p1297_p7 = pnand %p1296_p4, %p1425_p5 }
 0x51f   : > { %p1302_p11 = por %p1301_p10, %p1300_p9 }
 0x520   : > { %p1298_p8 = pneg %p1297_p7 }
 0x521   : > { %p1304_p13 = por %p1303_p12, %p1302_p11 }
 0x523   : > { %p1305_p0 = pnand %p1304_p13, %p1298_p8 }
 0x525   : > { %1308 = shalt.err (!%p1305_p0)
}
 0x526   : > { %s1351_s12 = smov 256  }
 0x527   : > { %1188 = dma.vmem_to_hbm [thread:$0]  (%p1425_p5), %s1644_s11, 512, %s1640_s14, %s1646_s25, %s1351_s12, %s1351_s12, %s1346_s16  }
 0x528 PF: > { %p1194_p1 = scmp.ge.s32.totalorder %s1343_s24, 2  ;;  %s1066_s13 = sand.u32 1, %s1331_s21  }
 0x529   : > { %s1067_s15 = scalar_lea.sflag [#allocation3], %s1066_s13 }
 0x52a   : > { %p1191_p2 = pnand %p1194_p1, %p1429_p6 }
 0x52c   : > { %1326 = dma.done.wait (!%p1191_p2), %s1067_s15, 512  }
 0x52d   : > { %1328 = vsyncadd (!%p1191_p2), %s1067_s15, 4294966784  ;;  %p16_p3 = scmp.ge.s32.totalorder %s1412_s27, 4   ;;  %s1699_s21 = smov %s1335_s22 }
 0x52e   : > { %s1700_s22 = smov %s1339_s23  ;;  %s1701_s23 = smov %s1423_s30 }
 0x52f   : > { %s1702_s24 = smov %s1412_s27  ;;  %18 = sbr.rel (!%p16_p3) target bundleno = 3 (0x3), region = 87 }
 0x536   :  { %1072 = vsyncpa [#allocation3], 1 }
 0x537   :  { %1074 = vsyncpa [#allocation3 + $0x1], 1 }

</bundles_post_ra>
